<compile_context>
chip_gen: v7x
topology: tpu7x:2x2x1
jax: 0.10.0
libtpu: 0.0.40
codegen_flags: <defaults>
</compile_context>

<pallas_src>
import math

import numpy as np
import jax
import jax.numpy as jnp
from jax.experimental import pallas as pl
from jax.experimental.pallas import tpu as pltpu

_LANES = 128


def _round_up(x, m):
    return ((x + m - 1) // m) * m


def _time2vec_kernel(x_ref, s_ref, w_ref, b_ref, m_ref, o_ref):
    """Writes one (TR, W) lane-dense output tile.

    x_ref: (TR, T)  f32   T consecutive time values per W-lane output row
    s_ref: (T, W)   bf16  0/1 selector, S[t, F*t + c] = 1          (resident)
    w_ref: (1, W)   f32   per-lane channel weights [w_lin|w_per]*T (resident)
    b_ref: (1, W)   f32   per-lane channel biases                  (resident)
    m_ref: (1, W)   i32   1 on periodic lanes, 0 on linear lanes   (resident)
    o_ref: (TR, W)        lane-dense output tile (f32 or bf16)
    """
    x = x_ref[...]

    # Exact 3-way bf16 split of the f32 time values (24 mantissa bits = 3 x 8).
    x0 = x.astype(jnp.bfloat16)
    r0 = x - x0.astype(jnp.float32)
    x1 = r0.astype(jnp.bfloat16)
    x2 = (r0 - x1.astype(jnp.float32)).astype(jnp.bfloat16)

    s = s_ref[...]
    # The otherwise-idle MXU spreads each time value across its F output lanes.
    # Each output lane receives exactly one nonzero product per pass and the
    # selector is exact in bf16, so three single-pass bf16 matmuls reconstruct
    # the f32 value exactly (to ~2^-33) — no f32 matmul emulation needed.
    spread = jnp.dot(x0, s, preferred_element_type=jnp.float32)
    spread = spread + jnp.dot(x1, s, preferred_element_type=jnp.float32)
    spread = spread + jnp.dot(x2, s, preferred_element_type=jnp.float32)

    # Plain f32 VPU multiply + add: same two roundings as the reference.
    y = spread * w_ref[...] + b_ref[...]

    # Constant (1, W) periodic-lane mask (resident operand; no per-tile iota).
    is_periodic = m_ref[...] != 0
    # NOTE: sin is still evaluated full-width; see TODO(synk) in the header.
    out = jnp.where(is_periodic, jnp.sin(y), y)
    o_ref[...] = out.astype(o_ref.dtype)


def _row_axis_semantics(num_steps):
    # v7x has 2 TensorCores per chip: plain PARALLEL is measured ~neutral, so
    # request CORE_PARALLEL there to actually shard the row axis across cores.
    # Single-TC parts (v5e/v6e) keep the known-good PARALLEL.
    try:
        kind = jax.devices()[0].device_kind.lower()
    except Exception:  # pragma: no cover - defensive
        kind = ""
    if num_steps >= 2 and ("v7" in kind or "7x" in kind):
        return pltpu.CORE_PARALLEL
    return pltpu.PARALLEL


def time2vec_pallas(x, w_lin, b_lin, w_per, b_per, *, tile_rows=1024,
                    out_dtype=jnp.float32, dimension_semantics=None):
    """Time2Vec forward.  x: any shape; params: (D,).  Returns (x.size, 2*D)."""
    D = int(w_lin.shape[0])
    if D < 1:
        raise ValueError("Time2Vec needs output_size >= 2")
    F = 2 * D                                   # output feature width

    # Time steps per output row: smallest T with 128 | F*T, scaled to >= 32 so
    # the (rows, T) input block is reasonably lane-dense while the selector
    # matmul stays cheap (K = T <= 64).
    t_base = _LANES // math.gcd(F, _LANES)
    T = t_base * max(1, 32 // t_base)
    W = F * T                                   # output row width (mult. of 128)

    xf = x.reshape(-1).astype(jnp.float32)      # torch x.view(-1, 1), flattened
    N = xf.shape[0]

    # Row tiling (sublane-aligned; 16-row alignment for sub-32-bit outputs).
    row_align = max(8, 32 // max(1, jnp.dtype(out_dtype).itemsize))
    rows_needed = -(-N // T)
    tr = min(int(tile_rows), _round_up(rows_needed, row_align))
    tr = _round_up(max(tr, row_align), row_align)
    rows_p = _round_up(rows_needed, tr)
    Np = rows_p * T

    if Np != N:                                 # pad only when not tile-aligned
        xf = jnp.pad(xf, (0, Np - N))
    x2 = xf.reshape(rows_p, T)                  # lane-dense-ish input view

    # Resident operands.
    s_mat = jnp.asarray(np.repeat(np.eye(T, dtype=np.float32), F, axis=1),
                        dtype=jnp.bfloat16)                         # (T, W)
    w_all = jnp.concatenate([w_lin.reshape(-1), w_per.reshape(-1)]
                            ).astype(jnp.float32)
    b_all = jnp.concatenate([b_lin.reshape(-1), b_per.reshape(-1)]
                            ).astype(jnp.float32)
    w_row = jnp.tile(w_all, T).reshape(1, W)
    b_row = jnp.tile(b_all, T).reshape(1, W)
    m_row = jnp.asarray(np.tile(np.arange(F) >= D, T).astype(np.int32)
                        ).reshape(1, W)

    grid = (rows_p // tr,)
    if dimension_semantics is None:
        dimension_semantics = (_row_axis_semantics(grid[0]),)

    out = pl.pallas_call(
        _time2vec_kernel,
        out_shape=jax.ShapeDtypeStruct((rows_p, W), out_dtype),
        grid_spec=pltpu.PrefetchScalarGridSpec(
            num_scalar_prefetch=0,
            grid=grid,
            in_specs=[
                pl.BlockSpec((tr, T), lambda i: (i, 0)),
                pl.BlockSpec((T, W), lambda i: (0, 0)),   # selector  (resident)
                pl.BlockSpec((1, W), lambda i: (0, 0)),   # weights   (resident)
                pl.BlockSpec((1, W), lambda i: (0, 0)),   # biases    (resident)
                pl.BlockSpec((1, W), lambda i: (0, 0)),   # lane mask (resident)
            ],
            out_specs=pl.BlockSpec((tr, W), lambda i: (i, 0)),
        ),
        compiler_params=pltpu.CompilerParams(
            dimension_semantics=dimension_semantics),
    )(x2, s_mat, w_row, b_row, m_row)

    out = out.reshape(Np, F)        # free bit-exact reshape of the lane-dense slab
    if Np != N:
        # NOTE (review): this prefix slice can cost an extra HBM pass if XLA
        # materializes it instead of fusing it into the consumer; callers that
        # care can take the padded slab and slice at the point of use.
        out = out[:N]
    return out


def time2vec_ref(x, w_lin, b_lin, w_per, b_per):
    """Pure-JAX reference mirroring the PyTorch forward."""
    xf = x.reshape(-1, 1).astype(jnp.float32)
    lin = xf * w_lin[None, :] + b_lin[None, :]
    per = jnp.sin(xf * w_per[None, :] + b_per[None, :])
    return jnp.concatenate([lin, per], axis=-1)


if __name__ == "__main__":
    # Module config: Time2Vec(output_size=16) -> D = 8, output last dim = 16.
    output_size = 16
    D = output_size // 2

    key = jax.random.PRNGKey(0)
    k_x, k_wl, k_bl, k_wp, k_bp = jax.random.split(key, 5)

    # Linear(1, D): weight (D, 1) in torch -> stored as (D,); bias (D,).
    w_lin = jax.random.uniform(k_wl, (D,), jnp.float32, -1.0, 1.0)
    b_lin = jax.random.uniform(k_bl, (D,), jnp.float32, -1.0, 1.0)
    w_per = jax.random.uniform(k_wp, (D,), jnp.float32, -1.0, 1.0)
    b_per = jax.random.uniform(k_bp, (D,), jnp.float32, -1.0, 1.0)

    # Aligned case (no padding) and a ragged case (exercises pad + trim).
    for shape in [(2, 64), (5, 23)]:
        x = jax.random.uniform(k_x, shape, jnp.float32, 0.0, 10.0)

        out = time2vec_pallas(x, w_lin, b_lin, w_per, b_per)
        out = jax.block_until_ready(out)

        ref = time2vec_ref(x, w_lin, b_lin, w_per, b_per)
        assert out.shape == (x.size, output_size), out.shape
        assert jnp.allclose(out, ref, atol=5e-5, rtol=1e-5), \
            f"mismatch vs reference for shape {shape}"

    # Optional bf16-output path (halves output HBM traffic for tolerant
    # consumers); compared against the f32 reference with bf16 tolerance.
    x = jax.random.uniform(k_x, (2, 64), jnp.float32, 0.0, 10.0)
    out_bf16 = jax.block_until_ready(
        time2vec_pallas(x, w_lin, b_lin, w_per, b_per, out_dtype=jnp.bfloat16))
    ref = time2vec_ref(x, w_lin, b_lin, w_per, b_per)
    assert out_bf16.dtype == jnp.bfloat16
    assert jnp.allclose(out_bf16.astype(jnp.float32), ref, atol=6e-2, rtol=2e-2), \
        "mismatch vs reference for bf16 output"

    print("KERNEL_OK")
</pallas_src>

<mosaic_0001>
module attributes {stable_mosaic.version = 11 : i64} {
  func.func @_time2vec_kernel(%arg0: i32, %arg1: memref<8x32xf32, #tpu.memory_space<vmem>>, %arg2: memref<32x512xbf16, #tpu.memory_space<vmem>>, %arg3: memref<1x512xf32, #tpu.memory_space<vmem>>, %arg4: memref<1x512xf32, #tpu.memory_space<vmem>>, %arg5: memref<1x512xi32, #tpu.memory_space<vmem>>, %arg6: memref<8x512xf32, #tpu.memory_space<vmem>>) attributes {dimension_semantics = [#tpu.dimension_semantics<parallel>], iteration_bounds = array<i64: 1>, scalar_prefetch = 0 : i64, scratch_operands = 0 : i64, tpu.core_type = #tpu.core_type<tc>, window_params = [{transform_indices = @transform_0, window_bounds = array<i64: 8, 32>}, {pipeline_mode = #tpu.pipeline_mode<synchronous>, transform_indices = @transform_1, window_bounds = array<i64: 32, 512>}, {pipeline_mode = #tpu.pipeline_mode<synchronous>, transform_indices = @transform_2, window_bounds = array<i64: 1, 512>}, {pipeline_mode = #tpu.pipeline_mode<synchronous>, transform_indices = @transform_3, window_bounds = array<i64: 1, 512>}, {pipeline_mode = #tpu.pipeline_mode<synchronous>, transform_indices = @transform_4, window_bounds = array<i64: 1, 512>}, {transform_indices = @transform_5, window_bounds = array<i64: 8, 512>}]} {
    %c0 = arith.constant 0 : index
    %c0_0 = arith.constant 0 : index
    %0 = vector.load %arg1[%c0, %c0_0] : memref<8x32xf32, #tpu.memory_space<vmem>>, vector<8x32xf32>
    %1 = arith.truncf %0 : vector<8x32xf32> to vector<8x32xbf16>
    %2 = arith.extf %1 : vector<8x32xbf16> to vector<8x32xf32>
    %3 = arith.subf %0, %2 : vector<8x32xf32>
    %4 = arith.truncf %3 : vector<8x32xf32> to vector<8x32xbf16>
    %5 = arith.extf %4 : vector<8x32xbf16> to vector<8x32xf32>
    %6 = arith.subf %3, %5 : vector<8x32xf32>
    %7 = arith.truncf %6 : vector<8x32xf32> to vector<8x32xbf16>
    %c0_1 = arith.constant 0 : index
    %c0_2 = arith.constant 0 : index
    %8 = vector.load %arg2[%c0_1, %c0_2] : memref<32x512xbf16, #tpu.memory_space<vmem>>, vector<32x512xbf16>
    %cst = arith.constant dense<0.000000e+00> : vector<8x512xf32>
    %9 = tpu.matmul %1, %8, %cst {dimension_numbers = #tpu.dot_dimension_numbers<[1], [0], [0], [1], [0, 0, 1, 1], [], []>} : vector<8x32xbf16>, vector<32x512xbf16>, vector<8x512xf32> -> vector<8x512xf32>
    %cst_3 = arith.constant dense<0.000000e+00> : vector<8x512xf32>
    %10 = tpu.matmul %4, %8, %cst_3 {dimension_numbers = #tpu.dot_dimension_numbers<[1], [0], [0], [1], [0, 0, 1, 1], [], []>} : vector<8x32xbf16>, vector<32x512xbf16>, vector<8x512xf32> -> vector<8x512xf32>
    %11 = arith.addf %9, %10 : vector<8x512xf32>
    %cst_4 = arith.constant dense<0.000000e+00> : vector<8x512xf32>
    %12 = tpu.matmul %7, %8, %cst_4 {dimension_numbers = #tpu.dot_dimension_numbers<[1], [0], [0], [1], [0, 0, 1, 1], [], []>} : vector<8x32xbf16>, vector<32x512xbf16>, vector<8x512xf32> -> vector<8x512xf32>
    %13 = arith.addf %11, %12 : vector<8x512xf32>
    %c0_5 = arith.constant 0 : index
    %c0_6 = arith.constant 0 : index
    %14 = vector.load %arg3[%c0_5, %c0_6] : memref<1x512xf32, #tpu.memory_space<vmem>>, vector<1x512xf32>
    %15 = vector.broadcast %14 : vector<1x512xf32> to vector<8x512xf32>
    %16 = arith.mulf %13, %15 : vector<8x512xf32>
    %c0_7 = arith.constant 0 : index
    %c0_8 = arith.constant 0 : index
    %17 = vector.load %arg4[%c0_7, %c0_8] : memref<1x512xf32, #tpu.memory_space<vmem>>, vector<1x512xf32>
    %18 = vector.broadcast %17 : vector<1x512xf32> to vector<8x512xf32>
    %19 = arith.addf %16, %18 : vector<8x512xf32>
    %c0_9 = arith.constant 0 : index
    %c0_10 = arith.constant 0 : index
    %20 = vector.load %arg5[%c0_9, %c0_10] : memref<1x512xi32, #tpu.memory_space<vmem>>, vector<1x512xi32>
    %c0_i32 = arith.constant 0 : i32
    %21 = vector.broadcast %c0_i32 : i32 to vector<1x512xi32>
    %22 = arith.cmpi ne, %20, %21 : vector<1x512xi32>
    %23 = math.sin %19 : vector<8x512xf32>
    %24 = vector.shape_cast %22 : vector<1x512xi1> to vector<1x512xi1>
    %25 = vector.broadcast %24 : vector<1x512xi1> to vector<8x512xi1>
    %26 = arith.select %25, %23, %19 : vector<8x512xi1>, vector<8x512xf32>
    %c0_11 = arith.constant 0 : index
    %c0_12 = arith.constant 0 : index
    %27 = vector.load %arg6[%c0_11, %c0_12] : memref<8x512xf32, #tpu.memory_space<vmem>>, vector<8x512xf32>
    tpu.vector_store %arg6[%c0_11, %c0_12], %26 {strides = array<i32>} : memref<8x512xf32, #tpu.memory_space<vmem>>, vector<8x512xf32>,
    return
  }
  func.func @transform_0(%arg0: i32) -> (i32, i32) {
    %c0_i32 = arith.constant 0 : i32
    %c0_i32_0 = arith.constant 0 : i32
    return %arg0, %c0_i32 : i32, i32
  }
  func.func @transform_1(%arg0: i32) -> (i32, i32) {
    %c0_i32 = arith.constant 0 : i32
    %c0_i32_0 = arith.constant 0 : i32
    %c0_i32_1 = arith.constant 0 : i32
    return %c0_i32, %c0_i32_0 : i32, i32
  }
  func.func @transform_2(%arg0: i32) -> (i32, i32) {
    %c0_i32 = arith.constant 0 : i32
    %c0_i32_0 = arith.constant 0 : i32
    %c0_i32_1 = arith.constant 0 : i32
    return %c0_i32, %c0_i32_0 : i32, i32
  }
  func.func @transform_3(%arg0: i32) -> (i32, i32) {
    %c0_i32 = arith.constant 0 : i32
    %c0_i32_0 = arith.constant 0 : i32
    %c0_i32_1 = arith.constant 0 : i32
    return %c0_i32, %c0_i32_0 : i32, i32
  }
  func.func @transform_4(%arg0: i32) -> (i32, i32) {
    %c0_i32 = arith.constant 0 : i32
    %c0_i32_0 = arith.constant 0 : i32
    %c0_i32_1 = arith.constant 0 : i32
    return %c0_i32, %c0_i32_0 : i32, i32
  }
  func.func @transform_5(%arg0: i32) -> (i32, i32) {
    %c0_i32 = arith.constant 0 : i32
    %c0_i32_0 = arith.constant 0 : i32
    return %arg0, %c0_i32 : i32, i32
  }
}

</mosaic_0001>

<bundles_post_ra>
// kernel: tpu_custom_call.1
= control target key start
LH: loop header
LB: loop body
LE: loop exit
PB: predicated region body
PF: predicated region fallthrough
CT: control target
= control target key end

     0   :  { %10 = vsyncpa [#allocation3], 0  ;;  %s1498_s0 = inlined_call_operand.hbm [shape: f32[8,32], index: 0, kind: input, shape index: {}]   ;;  %s1499_s1 = inlined_call_operand.hbm [shape: bf16[32,512], index: 1, kind: input, shape index: {}]   ;;  %s1500_s2 = inlined_call_operand.vmem [shape: f32[1,512], index: 2, kind: input, shape index: {}]   ;;  %s1501_s3 = inlined_call_operand.vmem [shape: f32[1,512], index: 3, kind: input, shape index: {}]   ;;  %s1502_s4 = inlined_call_operand.vmem [shape: s32[1,512], index: 4, kind: input, shape index: {}]   ;;  %s1503_s5 = inlined_call_operand.hbm [shape: f32[8,512], index: 5, kind: output, shape index: {}]  }
   0x1   :  { %11 = vsyncpa [#allocation6], 0 }
   0x2   :  { %12 = vsyncpa [#allocation4], 0  ;;  %s1053_s18 = smov [#allocation2]   ;;  %s1054_s20 = smov [#allocation5]  }
   0x3   :  { %s19_s19 = sshll.u32 %s1053_s18, 4  ;;  %s28_s21 = sshll.u32 %s1054_s20, 4  ;;  %s20_s19 = int_to_ptr.vmem [resolvable:$true] %s19_s19  ;;  %s1095_s21 = int_to_ptr.vmem [resolvable:$true] %s28_s21 }
   0x4   :  { %s981_s24 = scalar_lea.hbm %s1498_s0, 128 }
   0x5   :  { %p982_p0 = scmp.ne.s32.totalorder %s1498_s0, %s981_s24  ;;  %p985_p1 = scmp.lt.u32.totalorder %s981_s24, %s1498_s0 }
   0x7   :  { %p987_p2 = pnand %p985_p1, %p982_p0 }
   0x9   :  { %990 = shalt.err (!%p987_p2)
}
   0xa   :  { %s991_s29 = scalar_lea.vmem %s20_s19, 128  ;;  %p996_p4 = scmp.lt.s32.totalorder %s20_s19, %s20_s19 }
   0xb   :  { %p992_p3 = scmp.ne.s32.totalorder %s20_s19, %s991_s29  ;;  %p997_p5 = scmp.lt.s32.totalorder %s991_s29, %s991_s29 }
   0xd   :  { %p998_p6 = por %p997_p5, %p996_p4 }
   0xf   :  { %p999_p7 = pnand %p998_p6, %p992_p3 }
  0x11   :  { %1002 = shalt.err (!%p999_p7)
}
  0x12   :  { %22 = dma.hbm_to_vmem [thread:$0]  %s1498_s0, 128, %s20_s19, [#allocation3]  }
  0x13   :  { %s1003_s9 = scalar_lea.hbm %s1499_s1, 1024 }
  0x14   :  { %p1004_p8 = scmp.ne.s32.totalorder %s1499_s1, %s1003_s9  ;;  %p1007_p9 = scmp.lt.u32.totalorder %s1003_s9, %s1499_s1 }
  0x16   :  { %p1009_p10 = pnand %p1007_p9, %p1004_p8 }
  0x18   :  { %1012 = shalt.err (!%p1009_p10)
}
  0x19   :  { %s1013_s14 = scalar_lea.vmem %s1095_s21, 1024  ;;  %p1018_p12 = scmp.lt.s32.totalorder %s1095_s21, %s1095_s21 }
  0x1a   :  { %p1014_p11 = scmp.ne.s32.totalorder %s1095_s21, %s1013_s14  ;;  %p1019_p13 = scmp.lt.s32.totalorder %s1013_s14, %s1013_s14 }
  0x1c   :  { %p1020_p0 = por %p1019_p13, %p1018_p12 }
  0x1e   :  { %p1021_p1 = pnand %p1020_p0, %p1014_p11 }
  0x20   :  { %1024 = shalt.err (!%p1021_p1)
}
  0x21   :  { %s1055_s0 = smov 256   ;;  %s1056_s15 = smov 16  }
  0x22   :  { %34 = dma.hbm_to_vmem [thread:$0]  %s1499_s1, 1024, %s1095_s21, [#allocation6], %s1055_s0, %s1055_s0, %s1056_s15  }
  0x23   :  { %1047 = dma.done.wait [#allocation3], 128  }
  0x24   :  { %1048 = vsyncadd [#allocation3], 4294967168 }
  0x25   :  { %1049 = dma.done.wait [#allocation6], 1024  }
  0x26   :  { %1050 = vsyncadd [#allocation6], 4294966272  ;;  %v1057_v0 = vmov 0   ;;  %v953_v1 = vld [vmem:[#allocation5 + $0x4] ss:$16 sps:$4 sm:$0xff]   ;;  %v48_v9 = vld [vmem:[#allocation2] sm:$0xff]  ;;  %v366_v17 = vlaneseq }
  0x27   :  { %140 = vmatprep.mubr.bf16.mxu0 %v1057_v0  ;;  %181 = vmatprep.mubr.bf16.mxu1 %v1057_v0  ;;  %v955_v2 = vld [vmem:[#allocation5 + $0xc] ss:$16 sps:$4 sm:$0xff]   ;;  %v957_v3 = vld [vmem:[#allocation5] ss:$16 sps:$4 sm:$0xff]   ;;  %v958_v4 = vld [vmem:[#allocation5 + $0x8] ss:$16 sps:$4 sm:$0xff]   ;;  %v49_v10 = vpack.c.bf16 %v48_v9, %v48_v9 }
  0x28   :  { %108 = vmatprep.subr.bf16.mxu0 %v953_v1  ;;  %149 = vmatprep.subr.bf16.mxu1 %v955_v2  ;;  %v959_v5 = vld [vmem:[#allocation5 + $0x24] ss:$16 sps:$4 sm:$0xff]   ;;  %v961_v6 = vld [vmem:[#allocation5 + $0x2c] ss:$16 sps:$4 sm:$0xff]   ;;  %v963_v7 = vld [vmem:[#allocation5 + $0x20] ss:$16 sps:$4 sm:$0xff]  }
  0x29   :  { %109 = vmatpush1.bf16.msra.mxu0 %v957_v3  ;;  %150 = vmatpush1.bf16.msra.mxu1 %v958_v4  ;;  %v964_v8 = vld [vmem:[#allocation5 + $0x28] ss:$16 sps:$4 sm:$0xff]   ;;  %v50_v11 = vunpack.c.l.bf16 %v49_v10  ;;  %vm104_vm0 = vcmask 261120   ;;  %v367_v18 = vshrl.u32 %v366_v17, 7 }
  0x2a   :  { %110 = vmatprep.subr.bf16.mxu0 %v959_v5  ;;  %151 = vmatprep.subr.bf16.mxu1 %v961_v6  ;;  %v364_v21 = vld [vmem:[%s1500_s2] sm:$0xf] }
  0x2b   :  { %v51_v12 = vsub.f32 %v48_v9, %v50_v11  ;;  %v1138_v19 = vsub.s32 0, %v367_v18  ;;  %v1140_v20 = vsub.s32 2, %v367_v18  ;;  %v1145_v22 = vsub.s32 1, %v367_v18  ;;  %v390_v23 = vld [vmem:[%s1501_s3] sm:$0xf] }
  0x2c   :  { %v1150_v24 = vsub.s32 3, %v367_v18 }
  0x2d   :  { %111 = vmatpush1.bf16.msra.mxu0 %v963_v7  ;;  %152 = vmatpush1.bf16.msra.mxu1 %v964_v8  ;;  %v52_v13 = vpack.c.bf16 %v51_v12, %v51_v12  ;;  %v369_v25 = vrot.slane %v364_v21, %v1138_v19  ;;  %v377_v26 = vrot.slane %v364_v21, %v1140_v20 }
  0x2e   :  { %193 = vmatprep.subr.bf16.mxu0 %v953_v1  ;;  %234 = vmatprep.subr.bf16.mxu1 %v955_v2  ;;  %v373_v27 = vrot.slane %v364_v21, %v1145_v22  ;;  %v395_v28 = vrot.slane %v390_v23, %v1138_v19  ;;  %v403_v29 = vrot.slane %v390_v23, %v1140_v20 }
  0x2f   :  { %v53_v14 = vunpack.c.l.bf16 %v52_v13  ;;  %v399_v32 = vrot.slane %v390_v23, %v1145_v22  ;;  %v381_v33 = vrot.slane %v364_v21, %v1150_v24  ;;  %v407_v47 = vrot.slane %v390_v23, %v1150_v24 }
  0x30   :  { %887 = vmatmul.mubr.msk.bf16.vlgmr.msra.gmra.mrb[0].mxu0 %vm104_vm0, %v52_v13  ;;  %888 = vmatmul.mubr.msk.bf16.vlgmr.msra.gmra.mrb[0].mxu1 %vm104_vm0, %v52_v13  ;;  %v1058_v21 = vmov 683565275  }
  0x31   :  { %194 = vmatpush1.bf16.msra.mxu0 %v957_v3  ;;  %235 = vmatpush1.bf16.msra.mxu1 %v958_v4  ;;  %v54_v15 = vsub.f32 %v51_v12, %v53_v14 }
  0x32   :  { %195 = vmatprep.subr.bf16.mxu0 %v959_v5  ;;  %236 = vmatprep.subr.bf16.mxu1 %v961_v6 }
  0x33   :  { %225 = vmatprep.mubr.bf16.mxu0 %v1057_v0  ;;  %266 = vmatprep.mubr.bf16.mxu1 %v1057_v0  ;;  %v55_v16 = vpack.c.bf16 %v54_v15, %v54_v15 }
  0x35   :  { %196 = vmatpush1.bf16.msra.mxu0 %v963_v7  ;;  %237 = vmatpush1.bf16.msra.mxu1 %v964_v8 }
  0x36   :  { %278 = vmatprep.subr.bf16.mxu0 %v953_v1  ;;  %319 = vmatprep.subr.bf16.mxu1 %v955_v2 }
  0x3c   :  { %889 = vmatmul.mubr.msk.bf16.vlgmr.msra.gmra.mrb[0].mxu0 %vm104_vm0, %v49_v10  ;;  %890 = vmatmul.mubr.msk.bf16.vlgmr.msra.gmra.mrb[0].mxu1 %vm104_vm0, %v49_v10 }
  0x3d   :  { %279 = vmatpush1.bf16.msra.mxu0 %v957_v3  ;;  %320 = vmatpush1.bf16.msra.mxu1 %v958_v4 }
  0x3e   :  { %280 = vmatprep.subr.bf16.mxu0 %v959_v5  ;;  %321 = vmatprep.subr.bf16.mxu1 %v961_v6 }
  0x3f   :  { %310 = vmatprep.mubr.bf16.mxu0 %v1057_v0  ;;  %351 = vmatprep.mubr.bf16.mxu1 %v1057_v0 }
  0x41   :  { %281 = vmatpush1.bf16.msra.mxu0 %v963_v7  ;;  %322 = vmatpush1.bf16.msra.mxu1 %v964_v8 }
  0x48   :  { %891 = vmatmul.mubr.msk.bf16.vlgmr.msra.gmra.mrb[0].mxu0 %vm104_vm0, %v55_v16  ;;  %892 = vmatmul.mubr.msk.bf16.vlgmr.msra.gmra.mrb[0].mxu1 %vm104_vm0, %v55_v16 }
 0x11b   :  { %v312_v30 = vpop.f32.mrb[0].mxu0  ;;  %v353_v31 = vpop.f32.mrb[0].mxu1 }
 0x11c   :  { %v386_v34 = vmul.f32 %v369_v25, %v312_v30  ;;  %v388_v35 = vmul.f32 %v377_v26, %v353_v31  ;;  %v314_v36 = vpop.f32.mrb[1].mxu0  ;;  %v355_v37 = vpop.f32.mrb[1].mxu1  ;;  %v1059_v25 = vmov 2475754826   ;;  %v1061_v30 = vmov 2102212464  }
 0x11d   :  { %v387_v38 = vmul.f32 %v373_v27, %v314_v36  ;;  %v316_v39 = vpop.f32.mrb[2].mxu0  ;;  %v357_v40 = vpop.f32.mrb[2].mxu1  ;;  %v389_v46 = vmul.f32 %v381_v33, %v355_v37 }
 0x11e   :  { %v1159_v41 = vadd.f32 %v395_v28, %v386_v34  ;;  %v1161_v42 = vadd.f32 %v403_v29, %v388_v35  ;;  %v317_v43 = vpop.f32.mrb[3].mxu0  ;;  %v358_v44 = vpop.f32.mrb[3].mxu1  ;;  %v1060_v28 = vmov 2131351028   ;;  %v1063_v39 = vmov 1326507024  }
 0x11f   :  { %v1163_v45 = vadd.f32 %v399_v32, %v387_v38  ;;  %v1176_v58 = vadd.f32 %v407_v47, %v389_v46  ;;  %v1062_v32 = vmov 920167782  }
 0x120   :  { %v418_v48 = vand.u32 2147483647, %v1159_v41  ;;  %v421_v49 = vand.u32 2139095040, %v1159_v41  ;;  %v626_v50 = vand.u32 2147483647, %v1161_v42  ;;  %v629_v51 = vand.u32 2139095040, %v1161_v42 }
 0x121   :  { %v525_v54 = vand.u32 2139095040, %v1163_v45  ;;  %v522_v57 = vand.u32 2147483647, %v1163_v45  ;;  %v733_v5 = vand.u32 2139095040, %v1176_v58  ;;  %v730_v7 = vand.u32 2147483647, %v1176_v58 }
 0x122   :  { %v422_v52 = vshrl.u32 %v421_v49, 23  ;;  %v425_v53 = vand.u32 8388607, %v418_v48  ;;  %v630_v55 = vshrl.u32 %v629_v51, 23  ;;  %v633_v56 = vand.u32 8388607, %v626_v50 }
 0x123   :  { %v526_v60 = vshrl.u32 %v525_v54, 23  ;;  %v1180_v4 = vand.u32 8388607, %v522_v57  ;;  %v1191_v17 = vshrl.u32 %v733_v5, 23 }
 0x124   :  { %v893_v59 = vadd.s32 4294967169, %v422_v52  ;;  %v426_v61 = vor.u32 8388608, %v425_v53  ;;  %v901_v62 = vadd.s32 4294967169, %v630_v55  ;;  %v634_v63 = vor.u32 8388608, %v633_v56 }
 0x125   :  { %v897_v2 = vadd.s32 4294967169, %v526_v60  ;;  %v530_v16 = vor.u32 8388608, %v1180_v4 }
 0x126   :  { %v428_v1 = vadd.s32 1, %v893_v59  ;;  %v636_v3 = vadd.s32 1, %v901_v62  ;;  %v1184_v9 = vshll.u32 %v426_v61, 8  ;;  %v1186_v10 = vshll.u32 %v634_v63, 8 }
 0x127   :  { %v532_v6 = vadd.s32 1, %v897_v2 }
 0x128   :  { %vm429_vm1 = vcmp.gt.s32.totalorder %v428_v1, 0  ;;  %vm637_vm2 = vcmp.gt.s32.totalorder %v636_v3, 0 }
 0x129   :  { %v430_v8 = vsel %vm429_vm1, %v428_v1, 0  ;;  %v638_v13 = vsel %vm637_vm2, %v636_v3, 0  ;;  %vm533_vm3 = vcmp.gt.s32.totalorder %v532_v6, 0  ;;  %vm420_vm2 = vcmp.lt.s32.totalorder %v1159_v41, 0 }
 0x12a   :  { %v431_v11 = vshrl.u32 %v430_v8, 5  ;;  %v432_v12 = vand.u32 31, %v430_v8  ;;  %v1188_v14 = vshrl.u32 %v638_v13, 5  ;;  %v640_v15 = vand.u32 31, %v638_v13 }
 0x12b   :  { %v1195_v27 = vsel %vm533_vm3, %v532_v6, 0 }
 0x12c   :  { %v433_v18 = vsub.s32 32, %v432_v12  ;;  %v435_v23 = vshll.u32 %v1058_v21, %v432_v12  ;;  %v438_v26 = vshll.u32 %v1059_v25, %v432_v12  ;;  %v441_v29 = vshll.u32 %v1060_v28, %v432_v12 }
 0x12d   :  { %v444_v31 = vshll.u32 %v1061_v30, %v432_v12  ;;  %v447_v33 = vshll.u32 %v1062_v32, %v432_v12  ;;  %vm450_vm4 = vcmp.lt.s32.totalorder %v431_v11, 1  ;;  %vm451_vm5 = vcmp.lt.s32.totalorder %v431_v11, 2 }
 0x12e   :  { %v436_v34 = vshrl.u32 %v1059_v25, %v433_v18  ;;  %v439_v35 = vshrl.u32 %v1060_v28, %v433_v18  ;;  %v442_v36 = vshrl.u32 %v1061_v30, %v433_v18  ;;  %v434_v37 = vshrl.u32 %v1058_v21, %v433_v18 }
 0x12f   :  { %v445_v38 = vshrl.u32 %v1062_v32, %v433_v18  ;;  %v448_v40 = vshrl.u32 %v1063_v39, %v433_v18  ;;  %vm452_vm6 = vcmp.lt.s32.totalorder %v431_v11, 3  ;;  %v641_v47 = vsub.s32 32, %v640_v15 }
 0x130   :  { %v437_v43 = vor.u32 %v436_v34, %v435_v23  ;;  %v440_v44 = vor.u32 %v439_v35, %v438_v26  ;;  %v443_v46 = vor.u32 %v442_v36, %v441_v29  ;;  %vm453_vm7 = vcmp.lt.s32.totalorder %v431_v11, 4 }
 0x131   :  { %v446_v49 = vor.u32 %v445_v38, %v444_v31  ;;  %v449_v51 = vor.u32 %v448_v40, %v447_v33  ;;  %v643_v52 = vshll.u32 %v1058_v21, %v640_v15  ;;  %v646_v62 = vshll.u32 %v1059_v25, %v640_v15 }
 0x132   :  { %v454_v53 = vsel %vm450_vm4, %v434_v37, %v437_v43  ;;  %v455_v54 = vsel %vm453_vm7, %v443_v46, 2102212464  ;;  %v458_v55 = vsel %vm450_vm4, %v437_v43, %v440_v44  ;;  %v462_v56 = vsel %vm450_vm4, %v440_v44, %v443_v46 }
 0x133   :  { %v456_v59 = vsel %vm452_vm6, %v440_v44, %v455_v54  ;;  %v459_v60 = vsel %vm453_vm7, %v446_v49, 920167782  ;;  %v463_v61 = vsel %vm453_vm7, %v449_v51, 1326507024  ;;  %v642_v2 = vshrl.u32 %v1058_v21, %v641_v47 }
 0x134   :  { %v460_v63 = vsel %vm452_vm6, %v443_v46, %v459_v60  ;;  %v464_v1 = vsel %vm452_vm6, %v446_v49, %v463_v61  ;;  %v644_v3 = vshrl.u32 %v1059_v25, %v641_v47  ;;  %v457_v5 = vsel %vm451_vm5, %v454_v53, %v456_v59 }
 0x135   :  { %v461_v6 = vsel %vm451_vm5, %v458_v55, %v460_v63  ;;  %v465_v8 = vsel %vm451_vm5, %v462_v56, %v464_v1  ;;  %v647_v12 = vshrl.u32 %v1060_v28, %v641_v47  ;;  %v649_v33 = vshll.u32 %v1060_v28, %v640_v15 }
 0x136   :  { %v1221_v13 = vmul.u32.u64.low %v1184_v9, %v465_v8  ;;  %v1222_v18 = vmul.u32.u64.high %v1184_v9, %v465_v8, %v1221_v13  ;;  %v1225_v23 = vmul.u32.u64.low %v1184_v9, %v461_v6  ;;  %v1226_v26 = vmul.u32.u64.high %v1184_v9, %v461_v6, %v1225_v23 }
 0x137   :  { %v645_v29 = vor.u32 %v644_v3, %v643_v52  ;;  %v648_v31 = vor.u32 %v647_v12, %v646_v62  ;;  %v650_v34 = vshrl.u32 %v1061_v30, %v641_v47  ;;  %v473_v11 = vmul.u32 %v1184_v9, %v457_v5 }
 0x138   :  { %v652_v35 = vshll.u32 %v1061_v30, %v640_v15  ;;  %v653_v36 = vshrl.u32 %v1062_v32, %v641_v47  ;;  %v656_v37 = vshrl.u32 %v1063_v39, %v641_v47  ;;  %v655_v40 = vshll.u32 %v1062_v32, %v640_v15 }
 0x139   :  { %v651_v38 = vor.u32 %v650_v34, %v649_v33  ;;  %vm658_vm8 = vcmp.lt.s32.totalorder %v1188_v14, 1  ;;  %vm659_vm9 = vcmp.lt.s32.totalorder %v1188_v14, 2  ;;  %vm475_vm10 = vc.u32 %v1222_v18, %v1225_v23 }
 0x13a   :  { %v476_v43 = vadd.s32 1, %v1226_v26  ;;  %v654_v44 = vor.u32 %v653_v36, %v652_v35  ;;  %vm660_vm11 = vcmp.lt.s32.totalorder %v1188_v14, 3  ;;  %v657_v9 = vor.u32 %v656_v37, %v655_v40 }
 0x13b   :  { %vm661_vm12 = vcmp.lt.s32.totalorder %v1188_v14, 4  ;;  %v662_v46 = vsel %vm658_vm8, %v642_v2, %v645_v29  ;;  %v666_v47 = vsel %vm658_vm8, %v645_v29, %v648_v31  ;;  %v670_v52 = vsel %vm658_vm8, %v648_v31, %v651_v38 }
 0x13c   :  { %v477_v49 = vsel %vm475_vm10, %v476_v43, %v1226_v26  ;;  %v663_v15 = vsel %vm661_vm12, %v651_v38, 2102212464  ;;  %v667_v51 = vsel %vm661_vm12, %v654_v44, 920167782  ;;  %v671_v56 = vsel %vm661_vm12, %v657_v9, 1326507024 }
 0x13d   :  { %v478_v53 = vadd.s32 %v477_v49, %v473_v11  ;;  %v664_v54 = vsel %vm660_vm11, %v648_v31, %v663_v15  ;;  %v668_v55 = vsel %vm660_vm11, %v651_v38, %v667_v51  ;;  %v672_v61 = vsel %vm660_vm11, %v654_v44, %v671_v56 }
 0x13e   :  { %v665_v59 = vsel %vm659_vm9, %v662_v46, %v664_v54  ;;  %v669_v60 = vsel %vm659_vm9, %v666_v47, %v668_v55  ;;  %v535_v62 = vshrl.u32 %v1195_v27, 5  ;;  %v673_v1 = vsel %vm659_vm9, %v670_v52, %v672_v61 }
 0x13f   :  { %v479_v63 = vadd.s32 536870912, %v478_v53  ;;  %v1252_v2 = vmul.u32.u64.low %v1186_v10, %v669_v60  ;;  %v1253_v3 = vmul.u32.u64.high %v1186_v10, %v669_v60, %v1252_v2  ;;  %v536_v8 = vand.u32 31, %v1195_v27 }
 0x140   :  { %v1257_v5 = vmul.u32.u64.low %v1186_v10, %v673_v1  ;;  %v1258_v6 = vmul.u32.u64.high %v1186_v10, %v673_v1, %v1257_v5  ;;  %v1263_v12 = vshll.u32 %v530_v16, 8  ;;  %v681_v14 = vmul.u32 %v1186_v10, %v665_v59 }
 0x141   :  { %v1265_v13 = vshrl.u32 %v479_v63, 30  ;;  %vm554_vm13 = vcmp.lt.s32.totalorder %v535_v62, 1  ;;  %v905_v26 = vadd.s32 4294967169, %v1191_v17  ;;  %v537_v29 = vsub.s32 32, %v536_v8 }
 0x142   :  { %v539_v31 = vshll.u32 %v1058_v21, %v536_v8  ;;  %v542_v33 = vshll.u32 %v1059_v25, %v536_v8  ;;  %vm556_vm14 = vcmp.lt.s32.totalorder %v535_v62, 3  ;;  %v684_v27 = vadd.s32 1, %v1253_v3 }
 0x143   :  { %v481_v34 = vshll.u32 %v1265_v13, 30  ;;  %v545_v4 = vshll.u32 %v1060_v28, %v536_v8  ;;  %v548_v16 = vshll.u32 %v1061_v30, %v536_v8  ;;  %vm683_vm15 = vc.u32 %v1258_v6, %v1252_v2 }
 0x144   :  { %v538_v10 = vshrl.u32 %v1058_v21, %v537_v29  ;;  %v540_v17 = vshrl.u32 %v1059_v25, %v537_v29  ;;  %v551_v11 = vshll.u32 %v1062_v32, %v536_v8  ;;  %v685_v36 = vsel %vm683_vm15, %v684_v27, %v1253_v3 }
 0x145   :  { %v1280_v35 = vsub.s32 %v478_v53, %v481_v34  ;;  %v543_v37 = vshrl.u32 %v1060_v28, %v537_v29  ;;  %v546_v38 = vshrl.u32 %v1061_v30, %v537_v29  ;;  %v686_v40 = vadd.s32 %v685_v36, %v681_v14 }
 0x146   :  { %v541_v43 = vor.u32 %v540_v17, %v539_v31  ;;  %v549_v44 = vshrl.u32 %v1062_v32, %v537_v29  ;;  %v552_v9 = vshrl.u32 %v1063_v39, %v537_v29  ;;  %vm557_vm0 = vcmp.lt.s32.totalorder %v535_v62, 4 }
 0x147   :  { %v484_v46 = vsub.s32 0, %v1280_v35  ;;  %v544_v47 = vor.u32 %v543_v37, %v542_v33  ;;  %v547_v49 = vor.u32 %v546_v38, %v545_v4  ;;  %v687_v15 = vadd.s32 536870912, %v686_v40 }
 0x148   :  { %v550_v51 = vor.u32 %v549_v44, %v548_v16  ;;  %v553_v52 = vor.u32 %v552_v9, %v551_v11  ;;  %v558_v53 = vsel %vm554_vm13, %v538_v10, %v541_v43  ;;  %vm555_vm1 = vcmp.lt.s32.totalorder %v535_v62, 2 }
 0x149   :  { %v894_v54 = vmin.u32 %v484_v46, %v1280_v35  ;;  %v559_v55 = vsel %vm557_vm0, %v547_v49, 2102212464  ;;  %v562_v56 = vsel %vm554_vm13, %v541_v43, %v544_v47  ;;  %v566_v59 = vsel %vm554_vm13, %v544_v47, %v547_v49 }
 0x14a   :  { %v1292_v60 = vshrl.u32 %v687_v15, 30  ;;  %v560_v61 = vsel %vm556_vm14, %v544_v47, %v559_v55  ;;  %v563_v63 = vsel %vm557_vm0, %v550_v51, 920167782  ;;  %v567_v1 = vsel %vm557_vm0, %v553_v52, 1326507024 }
 0x14b   :  { %v486_v3 = vclz %v894_v54  ;;  %v564_v5 = vsel %vm556_vm14, %v547_v49, %v563_v63  ;;  %v568_v8 = vsel %vm556_vm14, %v550_v51, %v567_v1  ;;  %v737_v33 = vand.u32 8388607, %v730_v7 }
 0x14c   :  { %v689_v14 = vshll.u32 %v1292_v60, 30  ;;  %v565_v29 = vsel %vm555_vm1, %v562_v56, %v564_v5  ;;  %v569_v31 = vsel %vm555_vm1, %v566_v59, %v568_v8  ;;  %v561_v27 = vsel %vm555_vm1, %v558_v53, %v560_v61 }
 0x14d   :  { %v895_v34 = vadd.s32 4294967294, %v486_v3  ;;  %v1301_v4 = vmul.u32.u64.low %v1263_v12, %v569_v31  ;;  %v1302_v16 = vmul.u32.u64.high %v1263_v12, %v569_v31, %v1301_v4  ;;  %v740_v62 = vadd.s32 1, %v905_v26 }
 0x14e   :  { %v1304_v10 = vsub.s32 %v686_v40, %v689_v14  ;;  %v1307_v17 = vmul.u32.u64.low %v1263_v12, %v565_v29  ;;  %v1308_v11 = vmul.u32.u64.high %v1263_v12, %v565_v29, %v1307_v17  ;;  %v474_v36 = vadd.s32 %v1225_v23, %v1222_v18 }
 0x14f   :  { %vm896_vm3 = vcmp.lt.s32.totalorder %v895_v34, 0  ;;  %v682_v37 = vadd.s32 %v1252_v2, %v1258_v6  ;;  %v738_v40 = vor.u32 8388608, %v737_v33  ;;  %vm741_vm4 = vcmp.gt.s32.totalorder %v740_v62, 0 }
 0x150   :  { %v489_v38 = vsel %vm896_vm3, 0, %v895_v34  ;;  %v692_v43 = vsub.s32 0, %v1304_v10  ;;  %v577_v46 = vmul.u32 %v1263_v12, %v561_v27  ;;  %v504_v26 = vsub.s32 4, %v1265_v13 }
 0x151   :  { %v490_v44 = vsub.s32 32, %v489_v38  ;;  %v494_v9 = vsub.s32 4294967266, %v489_v38  ;;  %vm579_vm5 = vc.u32 %v1302_v16, %v1307_v17  ;;  %v580_v18 = vadd.s32 1, %v1308_v11 }
 0x152   :  { %v902_v47 = vmin.u32 %v692_v43, %v1304_v10  ;;  %v742_v23 = vsel %vm741_vm4, %v740_v62, 0  ;;  %v491_v2 = vshll.u32 %v1280_v35, %v489_v38  ;;  %v1325_v53 = vshll.u32 %v738_v40, 8 }
 0x153   :  { %v492_v6 = vshrl.u32 %v474_v36, %v490_v44  ;;  %v495_v49 = vadd.s32 127, %v494_v9  ;;  %v744_v15 = vand.u32 31, %v742_v23  ;;  %v581_v52 = vsel %vm579_vm5, %v580_v18, %v1308_v11 }
 0x154   :  { %v694_v51 = vclz %v902_v47  ;;  %v712_v12 = vsub.s32 4, %v1292_v60  ;;  %v582_v56 = vadd.s32 %v581_v52, %v577_v46  ;;  %v1328_v63 = vshrl.u32 %v742_v23, 5 }
 0x155   :  { %v493_v54 = vor.u32 %v492_v6, %v491_v2  ;;  %v496_v55 = vshll.u32 %v495_v49, 23  ;;  %v745_v59 = vsub.s32 32, %v744_v15  ;;  %v747_v1 = vshll.u32 %v1058_v21, %v744_v15 }
 0x156   :  { %v903_v61 = vadd.s32 4294967294, %v694_v51  ;;  %v1334_v35 = vsel %vm420_vm2, %v504_v26, %v1265_v13  ;;  %vm1338_vm6 = vcmp.le.f32.partialorder %v418_v48, 0.7853982  ;;  %v583_v8 = vadd.s32 536870912, %v582_v56 }
 0x157   :  { %v497_v5 = vor.u32 4788187, %v496_v55  ;;  %v750_v14 = vshll.u32 %v1059_v25, %v744_v15  ;;  %v753_v29 = vshll.u32 %v1060_v28, %v744_v15  ;;  %v500_v31 = vcvt.s32.f32 %v493_v54 }
 0x158   :  { %vm904_vm7 = vcmp.lt.s32.totalorder %v903_v61, 0  ;;  %v748_v33 = vshrl.u32 %v1059_v25, %v745_v59  ;;  %v751_v34 = vshrl.u32 %v1060_v28, %v745_v59  ;;  %v1346_v4 = vshrl.u32 %v583_v8, 30 }
 0x159   :  { %v498_v13 = vand.u32 2147483647, %v497_v5  ;;  %v697_v27 = vsel %vm904_vm7, 0, %v903_v61  ;;  %v754_v48 = vshrl.u32 %v1061_v30, %v745_v59  ;;  %v746_v36 = vshrl.u32 %v1058_v21, %v745_v59  ;;  %v416_v21 = vld [vmem:[%s1502_s4] sm:$0xf]  ;;  %s1064_s4 = smov [#allocation7]  }
 0x15a   :  { %v698_v11 = vsub.s32 32, %v697_v27  ;;  %v702_v62 = vsub.s32 4294967266, %v697_v27  ;;  %v756_v38 = vshll.u32 %v1061_v30, %v744_v15  ;;  %v699_v40 = vshll.u32 %v1304_v10, %v697_v27  ;;  %s869_s21 = sshll.u32 %s1064_s4, 4  ;;  %s870_s21 = int_to_ptr.vmem [resolvable:$true] %s869_s21 }
 0x15b   :  { %v501_v43 = vmul.f32 %v500_v31, %v498_v13  ;;  %v585_v44 = vshll.u32 %v1346_v4, 30  ;;  %v749_v25 = vor.u32 %v748_v33, %v747_v1  ;;  %v752_v46 = vor.u32 %v751_v34, %v750_v14  ;;  %s1025_s22 = scalar_lea.vmem %s870_s21, 512  ;;  %p1030_p3 = scmp.lt.s32.totalorder %s870_s21, %s870_s21 }
 0x15c   :  { %v700_v9 = vshrl.u32 %v682_v37, %v698_v11  ;;  %v703_v28 = vadd.s32 127, %v702_v62  ;;  %v757_v26 = vshrl.u32 %v1062_v32, %v745_v59  ;;  %v755_v23 = vor.u32 %v754_v48, %v753_v29  ;;  %p1026_p2 = scmp.ne.s32.totalorder %s870_s21, %s1025_s22  ;;  %p1031_p4 = scmp.lt.s32.totalorder %s1025_s22, %s1025_s22 }
 0x15d   :  { %v502_v47 = vxor.u32 2147483648, %v501_v43  ;;  %v1354_v18 = vsub.s32 %v582_v56, %v585_v44  ;;  %v760_v2 = vshrl.u32 %v1063_v39, %v745_v59  ;;  %v759_v6 = vshll.u32 %v1062_v32, %v744_v15 }
 0x15e   :  { %v701_v30 = vor.u32 %v700_v9, %v699_v40  ;;  %v704_v10 = vshll.u32 %v703_v28, 23  ;;  %vm762_vm8 = vcmp.lt.s32.totalorder %v1328_v63, 1  ;;  %vm628_vm9 = vcmp.lt.s32.totalorder %v1161_v42, 0  ;;  %p1032_p5 = por %p1031_p4, %p1030_p3 }
 0x15f   :  { %v503_v37 = vsel %vm420_vm2, %v502_v47, %v501_v43  ;;  %v588_v49 = vsub.s32 0, %v1354_v18  ;;  %v758_v51 = vor.u32 %v757_v26, %v756_v38  ;;  %vm763_vm10 = vcmp.lt.s32.totalorder %v1328_v63, 2 }
 0x160   :  { %v506_v39 = vsel %vm1338_vm6, %v1159_v41, %v503_v37  ;;  %vm1372_vm11 = vcmp.le.f32.partialorder %v626_v50, 0.7853982  ;;  %v705_v15 = vor.u32 4788187, %v704_v10  ;;  %v761_v52 = vor.u32 %v760_v2, %v759_v6  ;;  %p1033_p6 = pnand %p1032_p5, %p1026_p2 }
 0x161   :  { %vm765_vm12 = vcmp.lt.s32.totalorder %v1328_v63, 4  ;;  %vm417_vm13 = vcmp.ne.s32.totalorder %v416_v21, 0  ;;  %965 = vcosq.f32 %v506_v39  ;;  %v898_v54 = vmin.u32 %v588_v49, %v1354_v18 }
 0x162   :  { %vm764_vm14 = vcmp.lt.s32.totalorder %v1328_v63, 3  ;;  %v767_v55 = vsel %vm765_vm12, %v755_v23, 2102212464  ;;  %967 = vsinq.f32 %v506_v39  ;;  %v706_v56 = vand.u32 2147483647, %v705_v15 }
 0x163   :  { %v708_v59 = vcvt.s32.f32 %v701_v30  ;;  %v770_v50 = vsel %vm762_vm8, %v749_v25, %v752_v46  ;;  %v590_v61 = vclz %v898_v54  ;;  %v766_v1 = vsel %vm762_vm8, %v746_v36, %v749_v25 }
 0x164   :  { %v771_v5 = vsel %vm765_vm12, %v758_v51, 920167782  ;;  %v774_v8 = vsel %vm762_vm8, %v752_v46, %v755_v23  ;;  %v768_v29 = vsel %vm764_vm14, %v752_v46, %v767_v55  ;;  %v775_v33 = vsel %vm765_vm12, %v761_v52, 1326507024 }
 0x165   :  { %v709_v14 = vmul.f32 %v708_v59, %v706_v56  ;;  %v772_v31 = vsel %vm764_vm14, %v755_v23, %v771_v5  ;;  %v899_v34 = vadd.s32 4294967294, %v590_v61  ;;  %v776_v27 = vsel %vm764_vm14, %v758_v51, %v775_v33 }
 0x166   :  { %v773_v13 = vsel %vm763_vm10, %v770_v50, %v772_v31  ;;  %v507_v48 = vsel %vm1338_vm6, 0, %v1334_v35  ;;  %v777_v62 = vsel %vm763_vm10, %v774_v8, %v776_v27  ;;  %v578_v35 = vadd.s32 %v1307_v17, %v1302_v16 }
 0x167   :  { %v710_v11 = vxor.u32 2147483648, %v709_v14  ;;  %v1405_v36 = vmul.u32.u64.low %v1325_v53, %v773_v13  ;;  %v1406_v38 = vmul.u32.u64.high %v1325_v53, %v773_v13, %v1405_v36  ;;  %vm900_vm15 = vcmp.lt.s32.totalorder %v899_v34, 0 }
 0x168   :  { %v1410_v43 = vmul.u32.u64.low %v1325_v53, %v777_v62  ;;  %v1411_v40 = vmul.u32.u64.high %v1325_v53, %v777_v62, %v1410_v43  ;;  %v511_v44 = vadd.s32 3, %v507_v48  ;;  %v593_v3 = vsel %vm900_vm15, 0, %v899_v34 }
 0x169   :  { %v711_v25 = vsel %vm628_vm9, %v710_v11, %v709_v14  ;;  %v713_v9 = vsel %vm628_vm9, %v712_v12, %v1292_v60  ;;  %v594_v46 = vsub.s32 32, %v593_v3  ;;  %v598_v26 = vsub.s32 4294967266, %v593_v3 }
 0x16a   :  { %v714_v28 = vsel %vm1372_vm11, %v1161_v42, %v711_v25  ;;  %v769_v47 = vsel %vm763_vm10, %v766_v1, %v768_v29  ;;  %v788_v23 = vadd.s32 1, %v1406_v38  ;;  %v512_v16 = vand.u32 3, %v511_v44 }
 0x16b   :  { %969 = vcosq.f32 %v714_v28  ;;  %v966_v17 = vpop.eup %965  ;;  %v595_v2 = vshll.u32 %v1354_v18, %v593_v3  ;;  %v596_v30 = vshrl.u32 %v578_v35, %v594_v46  ;;  %v599_v10 = vadd.s32 127, %v598_v26 }
 0x16c   :  { %971 = vsinq.f32 %v714_v28  ;;  %v968_v60 = vpop.eup %967  ;;  %v1431_v12 = vsel %vm417_vm13, 1, %v1057_v0  ;;  %v785_v6 = vmul.u32 %v1325_v53, %v769_v47  ;;  %vm787_vm0 = vc.u32 %v1411_v40, %v1405_v36 }
 0x16d   :  { %v715_v63 = vsel %vm1372_vm11, 0, %v713_v9  ;;  %v597_v37 = vor.u32 %v596_v30, %v595_v2  ;;  %v600_v49 = vshll.u32 %v599_v10, 23  ;;  %v789_v51 = vsel %vm787_vm0, %v788_v23, %v1406_v38 }
 0x16e   :  { %v515_v18 = vxor.u32 2147483648, %v968_v60  ;;  %v790_v39 = vadd.s32 %v789_v51, %v785_v6  ;;  %vm514_vm1 = vcmp.eq.s32.totalorder %v512_v16, 0  ;;  %v518_v15 = vxor.u32 2147483648, %v966_v17 }
 0x16f   :  { %v838_v0 = vrot.slane %v1431_v12, %v1138_v19  ;;  %v601_v21 = vor.u32 4788187, %v600_v49  ;;  %vm517_vm2 = vcmp.eq.s32.totalorder %v512_v16, 2  ;;  %vm513_vm3 = vcmp.lt.s32.totalorder %v512_v16, 2 }
 0x170   :  { %v516_v52 = vsel %vm514_vm1, %v966_v17, %v515_v18  ;;  %v791_v53 = vadd.s32 536870912, %v790_v39  ;;  %v519_v54 = vsel %vm517_vm2, %v518_v15, %v968_v60  ;;  %v719_v55 = vadd.s32 3, %v715_v63 }
 0x171   :  { %v602_v32 = vand.u32 2147483647, %v601_v21  ;;  %v604_v56 = vcvt.s32.f32 %v597_v37  ;;  %v520_v59 = vsel %vm513_vm3, %v516_v52, %v519_v54  ;;  %v608_v50 = vsub.s32 4, %v1346_v4 }
 0x172   :  { %v1442_v61 = vshrl.u32 %v791_v53, 30  ;;  %vm510_vm4 = vweird.f32 %v1159_v41  ;;  %v720_v1 = vand.u32 3, %v719_v55  ;;  %vm1445_vm5 = vcmp.eq.s32.totalorder %v838_v0, 1 }
 0x173   :  { %v605_v5 = vmul.f32 %v604_v56, %v602_v32  ;;  %v521_v8 = vsel %vm510_vm4, nan, %v520_v59  ;;  %v846_v29 = vrot.slane %v1431_v12, %v1140_v20  ;;  %vm524_vm6 = vcmp.lt.s32.totalorder %v1163_v45, 0 }
 0x174   :  { %v793_v31 = vshll.u32 %v1442_v61, 30  ;;  %vm1455_vm7 = vcmp.le.f32.partialorder %v522_v57, 0.7853982  ;;  %v609_v27 = vsel %vm524_vm6, %v608_v50, %v1346_v4  ;;  %vm725_vm8 = vcmp.eq.s32.totalorder %v720_v1, 2 }
 0x175   :  { %v970_v14 = vpop.eup %969  ;;  %v606_v13 = vxor.u32 2147483648, %v605_v5  ;;  %v855_v20 = vsel %vm1445_vm5, %v521_v8, %v1159_v41  ;;  %vm721_vm9 = vcmp.lt.s32.totalorder %v720_v1, 2  ;;  %vm722_vm10 = vcmp.eq.s32.totalorder %v720_v1, 0 }
 0x176   :  { %v972_v33 = vpop.eup %971  ;;  %v726_v48 = vxor.u32 2147483648, %v970_v14  ;;  %v794_v11 = vsub.s32 %v790_v39, %v793_v31  ;;  %859 = vst [vmem:[#allocation7] sm:$0xff] %v855_v20  ;;  %vm853_vm11 = vcmp.eq.s32.totalorder %v846_v29, 1  ;;  %vm718_vm12 = vweird.f32 %v1161_v42 }
 0x177   :  { %v723_v62 = vxor.u32 2147483648, %v972_v33  ;;  %v607_v38 = vsel %vm524_vm6, %v606_v13, %v605_v5  ;;  %v611_v41 = vsel %vm1455_vm7, 0, %v609_v27  ;;  %v786_v16 = vadd.s32 %v1405_v36, %v1411_v40 }
 0x178   :  { %v727_v43 = vsel %vm725_vm8, %v726_v48, %v972_v33  ;;  %v610_v57 = vsel %vm1455_vm7, %v1163_v45, %v607_v38  ;;  %v796_v44 = vsub.s32 0, %v794_v11  ;;  %v615_v46 = vadd.s32 3, %v611_v41 }
 0x179   :  { %v724_v25 = vsel %vm722_vm10, %v970_v14, %v723_v62  ;;  %973 = vcosq.f32 %v610_v57  ;;  %v842_v10 = vrot.slane %v1431_v12, %v1145_v22  ;;  %vm614_vm2 = vweird.f32 %v1163_v45 }
 0x17a   :  { %v728_v4 = vsel %vm721_vm9, %v724_v25, %v727_v43  ;;  %975 = vsinq.f32 %v610_v57  ;;  %v906_v35 = vmin.u32 %v796_v44, %v794_v11  ;;  %v616_v23 = vand.u32 3, %v615_v46 }
 0x17b   :  { %v729_v3 = vsel %vm718_vm12, nan, %v728_v4  ;;  %vm852_vm1 = vcmp.eq.s32.totalorder %v842_v10, 1  ;;  %v816_v54 = vsub.s32 4, %v1442_v61  ;;  %vm732_vm3 = vcmp.lt.s32.totalorder %v1176_v58, 0 }
 0x17c   :  { %v857_v9 = vsel %vm853_vm11, %v729_v3, %v1161_v42  ;;  %v798_v28 = vclz %v906_v35  ;;  %vm621_vm14 = vcmp.eq.s32.totalorder %v616_v23, 2  ;;  %vm618_vm15 = vcmp.eq.s32.totalorder %v616_v23, 0 }
 0x17d   :  { %861 = vst [vmem:[#allocation7 + $0x10] sm:$0xff] %v857_v9  ;;  %vm617_vm0 = vcmp.lt.s32.totalorder %v616_v23, 2  ;;  %vm731_vm4 = vcmp.le.f32.partialorder %v730_v7, 0.7853982  ;;  %v817_v56 = vsel %vm732_vm3, %v816_v54, %v1442_v61  ;;  %v850_v8 = vrot.slane %v1431_v12, %v1150_v24 }
 0x17e   :  { %v907_v26 = vadd.s32 4294967294, %v798_v28  ;;  %v819_v50 = vsel %vm731_vm4, 0, %v817_v56  ;;  %vm822_vm9 = vweird.f32 %v1176_v58 }
 0x17f   :  { %v823_v1 = vadd.s32 3, %v819_v50  ;;  %vm854_vm8 = vcmp.eq.s32.totalorder %v850_v8, 1 }
 0x180   :  { %vm908_vm13 = vcmp.lt.s32.totalorder %v907_v26, 0 }
 0x181   :  { %v801_v47 = vsel %vm908_vm13, 0, %v907_v26 }
 0x182   :  { %v802_v17 = vsub.s32 32, %v801_v47  ;;  %v806_v2 = vsub.s32 4294967266, %v801_v47  ;;  %v803_v6 = vshll.u32 %v794_v11, %v801_v47 }
 0x183   :  { %v974_v30 = vpop.eup %973 }
 0x184   :  { %v976_v60 = vpop.eup %975  ;;  %v804_v63 = vshrl.u32 %v786_v16, %v802_v17  ;;  %v807_v42 = vadd.s32 127, %v806_v2  ;;  %v622_v37 = vxor.u32 2147483648, %v974_v30 }
 0x185   :  { %v619_v49 = vxor.u32 2147483648, %v976_v60 }
 0x186   :  { %v805_v51 = vor.u32 %v804_v63, %v803_v6  ;;  %v808_v18 = vshll.u32 %v807_v42, 23  ;;  %v623_v39 = vsel %vm621_vm14, %v622_v37, %v976_v60 }
 0x187   :  { %v620_v15 = vsel %vm618_vm15, %v974_v30, %v619_v49 }
 0x188   :  { %v809_v36 = vor.u32 4788187, %v808_v18  ;;  %v624_v40 = vsel %vm617_vm0, %v620_v15, %v623_v39  ;;  %v812_v21 = vcvt.s32.f32 %v805_v51 }
 0x189   :  { %v625_v0 = vsel %vm614_vm2, nan, %v624_v40 }
 0x18a   :  { %v810_v22 = vand.u32 2147483647, %v809_v36  ;;  %v856_v52 = vsel %vm852_vm1, %v625_v0, %v1163_v45  ;;  %v824_v45 = vand.u32 3, %v823_v1 }
 0x18b   :  { %860 = vst [vmem:[#allocation7 + $0x8] sm:$0xff] %v856_v52 }
 0x18c   :  { %v813_v53 = vmul.f32 %v812_v21, %v810_v22  ;;  %vm829_vm5 = vcmp.eq.s32.totalorder %v824_v45, 2  ;;  %vm826_vm6 = vcmp.eq.s32.totalorder %v824_v45, 0  ;;  %vm825_vm7 = vcmp.lt.s32.totalorder %v824_v45, 2 }
 0x18e   :  { %v814_v55 = vxor.u32 2147483648, %v813_v53 }
 0x190   :  { %v815_v32 = vsel %vm732_vm3, %v814_v55, %v813_v53 }
 0x191   :  { %v818_v59 = vsel %vm731_vm4, %v1176_v58, %v815_v32 }
 0x192   :  { %977 = vcosq.f32 %v818_v59 }
 0x193   :  { %979 = vsinq.f32 %v818_v59 }
 0x19c   :  { %v978_v5 = vpop.eup %977 }
 0x19d   :  { %v980_v19 = vpop.eup %979  ;;  %v830_v14 = vxor.u32 2147483648, %v978_v5 }
 0x19e   :  { %v827_v29 = vxor.u32 2147483648, %v980_v19 }
 0x19f   :  { %v831_v7 = vsel %vm829_vm5, %v830_v14, %v980_v19 }
 0x1a0   :  { %v828_v61 = vsel %vm826_vm6, %v978_v5, %v827_v29 }
 0x1a1   :  { %v832_v31 = vsel %vm825_vm7, %v828_v61, %v831_v7 }
 0x1a2   :  { %v833_v33 = vsel %vm822_vm9, nan, %v832_v31 }
 0x1a3   :  { %v858_v34 = vsel %vm854_vm8, %v833_v33, %v1176_v58 }
 0x1a4   :  { %862 = vst [vmem:[#allocation7 + $0x18] sm:$0xff] %v858_v34 }
 0x1a5   :  { %1036 = shalt.err (!%p1033_p6)
}
 0x1a6   :  { %s1037_s25 = scalar_lea.hbm %s1503_s5, 512 }
 0x1a7   :  { %p1038_p7 = scmp.ne.s32.totalorder %s1503_s5, %s1037_s25  ;;  %p1041_p8 = scmp.lt.u32.totalorder %s1037_s25, %s1503_s5 }
 0x1a9   :  { %p1043_p9 = pnand %p1041_p8, %p1038_p7 }
 0x1ab   :  { %1046 = shalt.err (!%p1043_p9)
}
 0x1ac   :  { %872 = dma.vmem_to_hbm [thread:$0]  %s870_s21, 512, %s1503_s5, [#allocation4]  }
 0x1ad   :  { %1051 = dma.done.wait [#allocation4], 512  }
 0x1ae   :  { %1052 = vsyncadd [#allocation4], 4294966784 }
 0x1af   :  { %876 = vsyncpa [#allocation3], 1 }
 0x1b0   :  { %877 = vsyncpa [#allocation6], 1 }
 0x1b1   :  { %878 = vsyncpa [#allocation4], 1 }

</bundles_post_ra>
